<compile_context>
chip_gen: v5e
topology: v5e:2x2
jax: 0.10.0
libtpu: 0.0.40
codegen_flags: <defaults>
</compile_context>

<pallas_src>
import functools

import jax
import jax.numpy as jnp
from jax.experimental import pallas as pl
from jax.experimental.pallas import tpu as pltpu

EPS = 1e-8


def _round_up(x: int, m: int) -> int:
    return ((x + m - 1) // m) * m


def _hard_negative_kernel(a_ref, p_ref, nT_ref, out_ref, dmin_ref, *,
                          margin: float, bn_valid: int, bnt: int):
    """temperature == 0: streaming min_j d_an over Bn tiles."""
    j = pl.program_id(1)

    @pl.when(j == 0)
    def _():
        dmin_ref[...] = jnp.full(dmin_ref.shape, jnp.inf, dmin_ref.dtype)

    # [bt, D] @ [D, bnt] -> [bt, bnt] on the MXU (RHS already lane-dense).
    d_an = 1.0 - jnp.dot(a_ref[...], nT_ref[...],
                         preferred_element_type=jnp.float32)
    col = j * bnt + jax.lax.broadcasted_iota(jnp.int32, d_an.shape, 1)
    d_an = jnp.where(col < bn_valid, d_an, jnp.inf)      # mask padded negatives
    dmin_ref[...] = jnp.minimum(dmin_ref[...],
                                jnp.min(d_an, axis=-1, keepdims=True))

    @pl.when(j == pl.num_programs(1) - 1)
    def _():
        d_ap = 1.0 - jnp.sum(a_ref[...] * p_ref[...], axis=-1, keepdims=True)
        out_ref[...] = jnp.maximum(d_ap - dmin_ref[...] + margin, 0.0)


def _gumbel_negative_kernel(a_ref, p_ref, nT_ref, g_ref, out_ref,
                            best_g_ref, best_d_ref, *,
                            margin: float, inv_temperature: float,
                            bn_valid: int, bnt: int):
    """temperature > 0: streaming Gumbel-argmax of softmax(-d_an / T)."""
    j = pl.program_id(1)

    @pl.when(j == 0)
    def _():
        best_g_ref[...] = jnp.full(best_g_ref.shape, -jnp.inf, best_g_ref.dtype)
        best_d_ref[...] = jnp.zeros(best_d_ref.shape, best_d_ref.dtype)

    d_an = 1.0 - jnp.dot(a_ref[...], nT_ref[...],
                         preferred_element_type=jnp.float32)
    col = j * bnt + jax.lax.broadcasted_iota(jnp.int32, d_an.shape, 1)
    valid = col < bn_valid
    # Gumbel-max trick: argmax_j(-d_an/T + G_j) ~ multinomial(softmax(-d_an/T)).
    g = jnp.where(valid, -d_an * inv_temperature + g_ref[...], -jnp.inf)
    g_row = jnp.max(g, axis=-1, keepdims=True)                        # [bt, 1]
    d_at_max = jnp.min(jnp.where(g >= g_row, d_an, jnp.inf),
                       axis=-1, keepdims=True)                        # [bt, 1]
    take_new = g_row > best_g_ref[...]
    best_d_ref[...] = jnp.where(take_new, d_at_max, best_d_ref[...])
    best_g_ref[...] = jnp.maximum(best_g_ref[...], g_row)

    @pl.when(j == pl.num_programs(1) - 1)
    def _():
        d_ap = 1.0 - jnp.sum(a_ref[...] * p_ref[...], axis=-1, keepdims=True)
        out_ref[...] = jnp.maximum(d_ap - best_d_ref[...] + margin, 0.0)


def batch_hard_triplet_margin_loss(anchor, positive, negative, *,
                                   margin: float = 1.0,
                                   temperature: float = 1.0,
                                   key=None,
                                   gumbel_noise=None):
    B, D = anchor.shape
    Bn, Dn = negative.shape
    assert Dn == D and positive.shape == (B, D)

    # ---- hoisted prep (plain XLA, done once; keeps the kernel MXU-bound) ----
    def _l2norm(x):
        x = x.astype(jnp.float32)
        return x * jax.lax.rsqrt(
            jnp.maximum(jnp.sum(x * x, axis=-1, keepdims=True), EPS * EPS))

    a_hat = _l2norm(anchor)
    p_hat = _l2norm(positive)
    n_hat = _l2norm(negative)

    # MXU-friendly tiles; small shapes collapse to a single full-dim tile.
    bt = 256 if B >= 256 else _round_up(B, 8)
    bnt = 256 if Bn >= 256 else _round_up(Bn, 128)
    b_pad = _round_up(B, bt)
    bn_pad = _round_up(Bn, bnt)
    d_pad = _round_up(D, 128)

    a_p = jnp.zeros((b_pad, d_pad), jnp.float32).at[:B, :D].set(a_hat)
    p_p = jnp.zeros((b_pad, d_pad), jnp.float32).at[:B, :D].set(p_hat)
    nT_p = jnp.zeros((d_pad, bn_pad), jnp.float32).at[:D, :Bn].set(n_hat.T)

    grid = (b_pad // bt, bn_pad // bnt)
    a_spec = pl.BlockSpec((bt, d_pad), lambda i, j: (i, 0))
    p_spec = pl.BlockSpec((bt, d_pad), lambda i, j: (i, 0))
    nT_spec = pl.BlockSpec((d_pad, bnt), lambda i, j: (0, j))
    out_spec = pl.BlockSpec((bt, 1), lambda i, j: (i, 0))
    out_shape = jax.ShapeDtypeStruct((b_pad, 1), jnp.float32)

    flops = 2 * b_pad * bn_pad * d_pad
    compiler_params = pltpu.CompilerParams(
        dimension_semantics=("parallel", "arbitrary"),
        vmem_limit_bytes=48 * 1024 * 1024,
    )

    if temperature == 0.0:
        kernel = functools.partial(_hard_negative_kernel, margin=float(margin),
                                   bn_valid=Bn, bnt=bnt)
        bytes_accessed = 4 * (2 * b_pad * d_pad + d_pad * bn_pad + b_pad)
        per_anchor = pl.pallas_call(
            kernel,
            out_shape=out_shape,
            grid=grid,
            in_specs=[a_spec, p_spec, nT_spec],
            out_specs=out_spec,
            scratch_shapes=[pltpu.VMEM((bt, 1), jnp.float32)],
            compiler_params=compiler_params,
            cost_estimate=pl.CostEstimate(flops=flops, transcendentals=0,
                                          bytes_accessed=bytes_accessed),
        )(a_p, p_p, nT_p)
    else:
        if gumbel_noise is None:
            if key is None:
                # TODO(synk): thread a fresh key per training step; a fixed key
                # reuses the same sampled negatives on every call.
                key = jax.random.PRNGKey(0)
            gumbel_noise = jax.random.gumbel(key, (B, Bn), jnp.float32)
        g_p = jnp.zeros((b_pad, bn_pad), jnp.float32).at[:B, :Bn].set(
            gumbel_noise.astype(jnp.float32))
        g_spec = pl.BlockSpec((bt, bnt), lambda i, j: (i, j))
        kernel = functools.partial(_gumbel_negative_kernel,
                                   margin=float(margin),
                                   inv_temperature=float(1.0 / temperature),
                                   bn_valid=Bn, bnt=bnt)
        bytes_accessed = 4 * (2 * b_pad * d_pad + d_pad * bn_pad
                              + b_pad * bn_pad + b_pad)
        per_anchor = pl.pallas_call(
            kernel,
            out_shape=out_shape,
            grid=grid,
            in_specs=[a_spec, p_spec, nT_spec, g_spec],
            out_specs=out_spec,
            scratch_shapes=[pltpu.VMEM((bt, 1), jnp.float32),
                            pltpu.VMEM((bt, 1), jnp.float32)],
            compiler_params=compiler_params,
            cost_estimate=pl.CostEstimate(flops=flops, transcendentals=0,
                                          bytes_accessed=bytes_accessed),
        )(a_p, p_p, nT_p, g_p)

    # Padded anchor rows are excluded from the mean.
    return jnp.mean(per_anchor[:B, 0])


def _reference_loss(anchor, positive, negative, *, margin, temperature,
                    gumbel_noise=None):
    """Pure-JAX reference (same Gumbel noise reused for the sampled path)."""
    def _l2norm(x):
        x = x.astype(jnp.float32)
        return x / jnp.maximum(jnp.linalg.norm(x, axis=-1, keepdims=True), EPS)

    a_hat, p_hat, n_hat = _l2norm(anchor), _l2norm(positive), _l2norm(negative)
    d_ap = 1.0 - jnp.sum(a_hat * p_hat, axis=-1)
    d_an = 1.0 - jnp.matmul(a_hat, n_hat.T,
                            precision=jax.lax.Precision.HIGHEST)
    if temperature == 0.0:
        d_sel = jnp.min(d_an, axis=1)
    else:
        g = -d_an / temperature + gumbel_noise
        idx = jnp.argmax(g, axis=1)
        d_sel = d_an[jnp.arange(d_an.shape[0]), idx]
    return jnp.mean(jnp.maximum(d_ap - d_sel + margin, 0.0))


if __name__ == "__main__":
    root = jax.random.PRNGKey(0)
    k1, k2, k3, k4 = jax.random.split(root, 4)
    B, Bn, D = 10, 12, 32          # exercises B / Bn / D padding + masking
    anchor = jax.random.normal(k1, (B, D), jnp.float32)
    positive = jax.random.normal(k2, (B, D), jnp.float32)
    negative = jax.random.normal(k3, (Bn, D), jnp.float32)

    # temperature == 0: deterministic hard-negative path vs pure-JAX reference.
    loss_t0 = batch_hard_triplet_margin_loss(
        anchor, positive, negative, margin=1.0, temperature=0.0)
    jax.block_until_ready(loss_t0)
    ref_t0 = _reference_loss(anchor, positive, negative,
                             margin=1.0, temperature=0.0)
    assert abs(float(loss_t0) - float(ref_t0)) < 2e-3, (loss_t0, ref_t0)

    # temperature == 1 (module default): Gumbel-max sampled negative, with the
    # same noise fed to kernel and reference.
    gumbel = jax.random.gumbel(k4, (B, Bn), jnp.float32)
    loss_t1 = batch_hard_triplet_margin_loss(
        anchor, positive, negative, margin=1.0, temperature=1.0,
        gumbel_noise=gumbel)
    jax.block_until_ready(loss_t1)
    ref_t1 = _reference_loss(anchor, positive, negative, margin=1.0,
                             temperature=1.0, gumbel_noise=gumbel)
    assert bool(jnp.isfinite(loss_t1))
    assert abs(float(loss_t1) - float(ref_t1)) < 2e-3, (loss_t1, ref_t1)

    print("KERNEL_OK")
</pallas_src>

<mosaic_0001>
module attributes {stable_mosaic.version = 11 : i64} {
  func.func @_hard_negative_kernel(%arg0: i32, %arg1: i32, %arg2: memref<16x128xf32, #tpu.memory_space<vmem>>, %arg3: memref<16x128xf32, #tpu.memory_space<vmem>>, %arg4: memref<128x128xf32, #tpu.memory_space<vmem>>, %arg5: memref<16x1xf32, #tpu.memory_space<vmem>>, %arg6: memref<16x1xf32, #tpu.memory_space<vmem>>) attributes {dimension_semantics = [#tpu.dimension_semantics<parallel>, #tpu.dimension_semantics<arbitrary>], iteration_bounds = array<i64: 1, 1>, scalar_prefetch = 0 : i64, scratch_operands = 1 : i64, tpu.core_type = #tpu.core_type<tc>, window_params = [{transform_indices = @transform_0, window_bounds = array<i64: 16, 128>}, {transform_indices = @transform_1, window_bounds = array<i64: 16, 128>}, {transform_indices = @transform_2, window_bounds = array<i64: 128, 128>}, {transform_indices = @transform_3, window_bounds = array<i64: 16, 1>}]} {
    %c0_i32 = arith.constant 0 : i32
    %0 = arith.cmpi eq, %arg1, %c0_i32 : i32
    %1 = arith.extui %0 : i1 to i32
    %c0_i32_0 = arith.constant 0 : i32
    %2 = arith.cmpi ne, %1, %c0_i32_0 : i32
    scf.if %2 {
      %cst_13 = arith.constant 0x7F800000 : f32
      %24 = vector.broadcast %cst_13 : f32 to vector<16x1xf32>
      %c0_14 = arith.constant 0 : index
      %c0_15 = arith.constant 0 : index
      %25 = vector.load %arg6[%c0_14, %c0_15] : memref<16x1xf32, #tpu.memory_space<vmem>>, vector<16x1xf32>
      tpu.vector_store %arg6[%c0_14, %c0_15], %24 {strides = array<i32>} : memref<16x1xf32, #tpu.memory_space<vmem>>, vector<16x1xf32>,
    } else {
    }
    %c0 = arith.constant 0 : index
    %c0_1 = arith.constant 0 : index
    %3 = vector.load %arg2[%c0, %c0_1] : memref<16x128xf32, #tpu.memory_space<vmem>>, vector<16x128xf32>
    %c0_2 = arith.constant 0 : index
    %c0_3 = arith.constant 0 : index
    %4 = vector.load %arg4[%c0_2, %c0_3] : memref<128x128xf32, #tpu.memory_space<vmem>>, vector<128x128xf32>
    %cst = arith.constant dense<0.000000e+00> : vector<16x128xf32>
    %5 = tpu.matmul %3, %4, %cst {dimension_numbers = #tpu.dot_dimension_numbers<[1], [0], [0], [1], [0, 0, 1, 1], [], []>} : vector<16x128xf32>, vector<128x128xf32>, vector<16x128xf32> -> vector<16x128xf32>
    %cst_4 = arith.constant 1.000000e+00 : f32
    %6 = vector.broadcast %cst_4 : f32 to vector<16x128xf32>
    %7 = arith.subf %6, %5 : vector<16x128xf32>
    %c128_i32 = arith.constant 128 : i32
    %8 = arith.muli %arg1, %c128_i32 : i32
    %9 = tpu.iota {dimensions = array<i32: 1>} : vector<16x128xi32>
    %10 = vector.broadcast %8 : i32 to vector<16x128xi32>
    %11 = arith.addi %10, %9 : vector<16x128xi32>
    %c12_i32 = arith.constant 12 : i32
    %12 = vector.broadcast %c12_i32 : i32 to vector<16x128xi32>
    %13 = arith.cmpi slt, %11, %12 : vector<16x128xi32>
    %cst_5 = arith.constant 0x7F800000 : f32
    %14 = vector.broadcast %cst_5 : f32 to vector<16x128xf32>
    %15 = arith.select %13, %7, %14 : vector<16x128xi1>, vector<16x128xf32>
    %c0_6 = arith.constant 0 : index
    %c0_7 = arith.constant 0 : index
    %16 = vector.load %arg6[%c0_6, %c0_7] : memref<16x1xf32, #tpu.memory_space<vmem>>, vector<16x1xf32>
    %cst_8 = arith.constant dense<0x7F800000> : vector<16xf32>
    %17 = vector.multi_reduction <minimumf>, %15, %cst_8 [1] : vector<16x128xf32> to vector<16xf32>
    %18 = vector.shape_cast %17 : vector<16xf32> to vector<16x1xf32>
    %19 = arith.minimumf %16, %18 : vector<16x1xf32>
    %c0_9 = arith.constant 0 : index
    %c0_10 = arith.constant 0 : index
    %20 = vector.load %arg6[%c0_9, %c0_10] : memref<16x1xf32, #tpu.memory_space<vmem>>, vector<16x1xf32>
    tpu.vector_store %arg6[%c0_9, %c0_10], %19 {strides = array<i32>} : memref<16x1xf32, #tpu.memory_space<vmem>>, vector<16x1xf32>,
    %c0_i32_11 = arith.constant 0 : i32
    %21 = arith.cmpi eq, %arg1, %c0_i32_11 : i32
    %22 = arith.extui %21 : i1 to i32
    %c0_i32_12 = arith.constant 0 : i32
    %23 = arith.cmpi ne, %22, %c0_i32_12 : i32
    scf.if %23 {
      %c0_13 = arith.constant 0 : index
      %c0_14 = arith.constant 0 : index
      %24 = vector.load %arg2[%c0_13, %c0_14] : memref<16x128xf32, #tpu.memory_space<vmem>>, vector<16x128xf32>
      %c0_15 = arith.constant 0 : index
      %c0_16 = arith.constant 0 : index
      %25 = vector.load %arg3[%c0_15, %c0_16] : memref<16x128xf32, #tpu.memory_space<vmem>>, vector<16x128xf32>
      %26 = arith.mulf %24, %25 : vector<16x128xf32>
      %cst_17 = arith.constant dense<0.000000e+00> : vector<16xf32>
      %27 = vector.multi_reduction <add>, %26, %cst_17 [1] : vector<16x128xf32> to vector<16xf32>
      %28 = vector.shape_cast %27 : vector<16xf32> to vector<16x1xf32>
      %cst_18 = arith.constant 1.000000e+00 : f32
      %29 = vector.broadcast %cst_18 : f32 to vector<16x1xf32>
      %30 = arith.subf %29, %28 : vector<16x1xf32>
      %c0_19 = arith.constant 0 : index
      %c0_20 = arith.constant 0 : index
      %31 = vector.load %arg6[%c0_19, %c0_20] : memref<16x1xf32, #tpu.memory_space<vmem>>, vector<16x1xf32>
      %32 = arith.subf %30, %31 : vector<16x1xf32>
      %cst_21 = arith.constant 1.000000e+00 : f32
      %33 = vector.broadcast %cst_21 : f32 to vector<16x1xf32>
      %34 = arith.addf %32, %33 : vector<16x1xf32>
      %cst_22 = arith.constant 0.000000e+00 : f32
      %35 = vector.broadcast %cst_22 : f32 to vector<16x1xf32>
      %36 = arith.maximumf %34, %35 : vector<16x1xf32>
      %c0_23 = arith.constant 0 : index
      %c0_24 = arith.constant 0 : index
      %37 = vector.load %arg5[%c0_23, %c0_24] : memref<16x1xf32, #tpu.memory_space<vmem>>, vector<16x1xf32>
      tpu.vector_store %arg5[%c0_23, %c0_24], %36 {strides = array<i32>} : memref<16x1xf32, #tpu.memory_space<vmem>>, vector<16x1xf32>,
    } else {
    }
    return
  }
  func.func @transform_0(%arg0: i32, %arg1: i32) -> (i32, i32) {
    %c0_i32 = arith.constant 0 : i32
    %c0_i32_0 = arith.constant 0 : i32
    return %arg0, %c0_i32 : i32, i32
  }
  func.func @transform_1(%arg0: i32, %arg1: i32) -> (i32, i32) {
    %c0_i32 = arith.constant 0 : i32
    %c0_i32_0 = arith.constant 0 : i32
    return %arg0, %c0_i32 : i32, i32
  }
  func.func @transform_2(%arg0: i32, %arg1: i32) -> (i32, i32) {
    %c0_i32 = arith.constant 0 : i32
    %c0_i32_0 = arith.constant 0 : i32
    return %c0_i32, %arg1 : i32, i32
  }
  func.func @transform_3(%arg0: i32, %arg1: i32) -> (i32, i32) {
    %c0_i32 = arith.constant 0 : i32
    %c0_i32_0 = arith.constant 0 : i32
    return %arg0, %c0_i32 : i32, i32
  }
}

</mosaic_0001>

<bundles_post_ra>
// kernel: tpu_custom_call.1
= control target key start
LH: loop header
LB: loop body
LE: loop exit
PB: predicated region body
PF: predicated region fallthrough
CT: control target
= control target key end

     0   :  { %8 = vsyncpa [#allocation4], 0  ;;  %s306_s0 = inlined_call_operand.hbm [shape: f32[16,128], index: 0, kind: input, shape index: {}]   ;;  %s307_s1 = inlined_call_operand.hbm [shape: f32[16,128], index: 1, kind: input, shape index: {}]   ;;  %s308_s2 = inlined_call_operand.hbm [shape: f32[128,128], index: 2, kind: input, shape index: {}]   ;;  %s309_s3 = inlined_call_operand.vmem [shape: f32[16,1], index: 3, kind: output, shape index: {}]  }
   0x1   :  { %9 = vsyncpa [#allocation6], 0  ;;  %s27_s14 = sshll.u32 %s307_s1, 4  ;;  %s259_s15 = smov [#allocation5]   ;;  %s28_s14 = int_to_ptr.hbm [resolvable:$true] %s27_s14 }
   0x2   :  { %s29_s16 = sshll.u32 %s259_s15, 4  ;;  %s14_s19 = sshll.u32 %s306_s0, 4  ;;  %s30_s16 = int_to_ptr.vmem [resolvable:$true] %s29_s16  ;;  %s15_s19 = int_to_ptr.hbm [resolvable:$true] %s14_s19 }
   0x3   :  { %s260_s20 = smov 128   ;;  %s261_s21 = smov 8  }
   0x4   :  { %35 = dma.hbm_to_vmem [thread:$0]  %s28_s14, 256, %s30_s16, [#allocation6], %s260_s20, %s260_s20, %s261_s21  }
   0x5   :  { %s262_s22 = smov [#allocation3]   ;;  %s40_s26 = sshll.u32 %s308_s2, 4  ;;  %s41_s26 = int_to_ptr.hbm [resolvable:$true] %s40_s26 }
   0x6   :  { %s16_s23 = sshll.u32 %s262_s22, 4  ;;  %s263_s1 = smov [#allocation7]   ;;  %s17_s23 = int_to_ptr.vmem [resolvable:$true] %s16_s23 }
   0x7   :  { %22 = dma.hbm_to_vmem [thread:$0]  %s15_s19, 256, %s17_s23, [#allocation4], %s260_s20, %s260_s20, %s261_s21  }
   0x8   :  { %s42_s27 = sshll.u32 %s263_s1, 4  ;;  %s43_s27 = int_to_ptr.vmem [resolvable:$true] %s42_s27 }
   0x9   :  { %48 = dma.hbm_to_vmem [thread:$0]  %s41_s26, 2048, %s43_s27, [#allocation6], %s260_s20, %s260_s20, %s261_s21  }
   0xa   :  { %255 = dma.done.wait [#allocation4], 256  }
   0xb   :  { %256 = vsyncadd [#allocation4], 4294967040 }
   0xc   :  { %257 = dma.done.wait [#allocation6], 2304  }
   0xd   :  { %258 = vsyncadd [#allocation6], 4294964992  ;;  %v85_v0 = vld [vmem:[#allocation7 + $0x78] sm:$0xff]  ;;  %v84_v1 = vld [vmem:[#allocation7 + $0x70] sm:$0xff]  ;;  %vm65_vm0 = vcmask 7168   ;;  %v264_v22 = vmov inf   ;;  %v112_v23 = vlaneseq }
   0xe   :  { %86 = vmatpush.msra.mxu0 %v85_v0  ;;  %161 = vmatpush.msra.mxu1 %v85_v0  ;;  %v83_v2 = vld [vmem:[#allocation7 + $0x68] sm:$0xff]  ;;  %v82_v3 = vld [vmem:[#allocation7 + $0x60] sm:$0xff]  ;;  %v81_v4 = vld [vmem:[#allocation7 + $0x58] sm:$0xff]  ;;  %66 = vst.msk [vmem:[#allocation2] sm:$0xff] %vm65_vm0, %v264_v22 }
   0xf   :  { %v80_v5 = vld [vmem:[#allocation7 + $0x50] sm:$0xff]  ;;  %v79_v6 = vld [vmem:[#allocation7 + $0x48] sm:$0xff]  ;;  %v78_v7 = vld [vmem:[#allocation7 + $0x40] sm:$0xff]  ;;  %67 = vst.msk [vmem:[#allocation2 + $0x8] sm:$0xff] %vm65_vm0, %v264_v22  ;;  %v113_v24 = vand.u32 127, %v112_v23 }
  0x10   :  { %87 = vmatpush.msra.mxu0 %v84_v1  ;;  %162 = vmatpush.msra.mxu1 %v84_v1  ;;  %v77_v8 = vld [vmem:[#allocation7 + $0x38] sm:$0xff]  ;;  %v76_v9 = vld [vmem:[#allocation7 + $0x30] sm:$0xff]  ;;  %v75_v10 = vld [vmem:[#allocation7 + $0x28] sm:$0xff] }
  0x11   :  { %v74_v11 = vld [vmem:[#allocation7 + $0x20] sm:$0xff]  ;;  %v73_v12 = vld [vmem:[#allocation7 + $0x18] sm:$0xff]  ;;  %v72_v13 = vld [vmem:[#allocation7 + $0x10] sm:$0xff]  ;;  %vm116_vm1 = vcmp.lt.s32.totalorder %v113_v24, 12 }
  0x12   :  { %88 = vmatpush.msra.mxu0 %v83_v2  ;;  %163 = vmatpush.msra.mxu1 %v83_v2  ;;  %v71_v14 = vld [vmem:[#allocation7 + $0x8] sm:$0xff]  ;;  %v70_v15 = vld [vmem:[#allocation7] sm:$0xff]  ;;  %v135_v18 = vld [vmem:[#allocation5] sm:$0xff] }
  0x13   :  { %v68_v16 = vld [vmem:[#allocation3] sm:$0xff]  ;;  %v69_v17 = vld [vmem:[#allocation3 + $0x8] sm:$0xff]  ;;  %v136_v20 = vld [vmem:[#allocation5 + $0x8] sm:$0xff] }
  0x14   :  { %89 = vmatpush.msra.mxu0 %v82_v3  ;;  %164 = vmatpush.msra.mxu1 %v82_v3  ;;  %v137_v19 = vmul.f32 %v135_v18, %v68_v16  ;;  %v138_v21 = vmul.f32 %v136_v20, %v69_v17 }
  0x15   :  { %v119_v31 = vld [vmem:[#allocation2] sm:$0xff] }
  0x16   :  { %90 = vmatpush.msra.mxu0 %v81_v4  ;;  %165 = vmatpush.msra.mxu1 %v81_v4  ;;  %v120_v35 = vld [vmem:[#allocation2 + $0x8] sm:$0xff] }
  0x17   :  { %139 = vadd.xlane.f32.xlu1 %v137_v19 }
  0x18   :  { %91 = vmatpush.msra.mxu0 %v80_v5  ;;  %166 = vmatpush.msra.mxu1 %v80_v5 }
  0x1a   :  { %92 = vmatpush.msra.mxu0 %v79_v6  ;;  %167 = vmatpush.msra.mxu1 %v79_v6 }
  0x1c   :  { %93 = vmatpush.msra.mxu0 %v78_v7  ;;  %168 = vmatpush.msra.mxu1 %v78_v7 }
  0x1e   :  { %94 = vmatpush.msra.mxu0 %v77_v8  ;;  %169 = vmatpush.msra.mxu1 %v77_v8 }
  0x1f   :  { %141 = vadd.xlane.f32.xlu1 %v138_v21 }
  0x20   :  { %95 = vmatpush.msra.mxu0 %v76_v9  ;;  %170 = vmatpush.msra.mxu1 %v76_v9 }
  0x22   :  { %96 = vmatpush.msra.mxu0 %v75_v10  ;;  %171 = vmatpush.msra.mxu1 %v75_v10 }
  0x24   :  { %97 = vmatpush.msra.mxu0 %v74_v11  ;;  %172 = vmatpush.msra.mxu1 %v74_v11 }
  0x26   :  { %98 = vmatpush.msra.mxu0 %v73_v12  ;;  %173 = vmatpush.msra.mxu1 %v73_v12 }
  0x28   :  { %99 = vmatpush.msra.mxu0 %v72_v13  ;;  %174 = vmatpush.msra.mxu1 %v72_v13 }
  0x2a   :  { %100 = vmatpush.msra.mxu0 %v71_v14  ;;  %175 = vmatpush.msra.mxu1 %v71_v14 }
  0x2c   :  { %101 = vmatpush.msra.mxu0 %v70_v15  ;;  %176 = vmatpush.msra.mxu1 %v70_v15 }
  0x2d   :  { %102 = vmatmul.f32.vlgmr.msra.gmra.mxu0 %v68_v16  ;;  %105 = vmatmul.f32.vlgmr.msra.gmra.mxu1 %v69_v17 }
  0x8a   :  { %v140_v34 = vpop.xlane.xlu1 %139 }
  0x8b   :  { %v143_v36 = vsub.f32 1.0, %v140_v34 }
  0x92   :  { %v142_v41 = vpop.xlane.xlu1 %141 }
  0x93   :  { %v144_v44 = vsub.f32 1.0, %v142_v41 }
  0xaa   :  { %v103_v25 = vpop.f32.mrf.mxu0  ;;  %v106_v27 = vpop.f32.mrf.mxu1 }
  0xab   :  { %v109_v26 = vsub.f32 1.0, %v103_v25  ;;  %v110_v29 = vsub.f32 1.0, %v106_v27 }
  0xad   :  { %v117_v28 = vsel %vm116_vm1, %v109_v26, inf  ;;  %v118_v30 = vsel %vm116_vm1, %v110_v29, inf }
  0xae   :  { %121 = vmin.xlane.f32.xlu0 %v117_v28 }
  0xb6   :  { %123 = vmin.xlane.f32.xlu0 %v118_v30 }
 0x121   :  { %v122_v32 = vpop.xlane.xlu0 %121 }
 0x122   :  { %v125_v33 = vmin.f32 %v119_v31, %v122_v32 }
 0x124   :  { %128 = vst.msk [vmem:[#allocation2] sm:$0xff] %vm65_vm0, %v125_v33 }
 0x129   :  { %v124_v37 = vpop.xlane.xlu0 %123 }
 0x12a   :  { %v126_v38 = vmin.f32 %v120_v35, %v124_v37 }
 0x12b   :  { %v145_v39 = vld [vmem:[#allocation2] sm:$0xff] }
 0x12c   :  { %v147_v40 = vsub.f32 %v143_v36, %v145_v39  ;;  %129 = vst.msk [vmem:[#allocation2 + $0x8] sm:$0xff] %vm65_vm0, %v126_v38 }
 0x12e   :  { %v149_v42 = vadd.f32 1.0, %v147_v40 }
 0x130   :  { %v151_v43 = vmax.f32 %v149_v42, 0.0 }
 0x132   :  { %153 = vst.msk [vmem:[%s309_s3] sm:$0xff] %vm65_vm0, %v151_v43 }
 0x133   :  { %v146_v45 = vld [vmem:[#allocation2 + $0x8] sm:$0xff] }
 0x134   :  { %v148_v46 = vsub.f32 %v144_v44, %v146_v45 }
 0x136   :  { %v150_v47 = vadd.f32 1.0, %v148_v46 }
 0x138   :  { %v152_v48 = vmax.f32 %v150_v47, 0.0 }
 0x13a   :  { %154 = vst.msk [vmem:[%s309_s3 + $0x8] sm:$0xff] %vm65_vm0, %v152_v48 }
 0x13b   :  { %159 = vsyncpa [#allocation4], 1 }
 0x13c   :  { %160 = vsyncpa [#allocation6], 1 }

</bundles_post_ra>
